<compile_context>
chip_gen: v5e
topology: v5e:2x2
jax: 0.10.0
libtpu: 0.0.40
codegen_flags: <defaults>
</compile_context>

<pallas_src>
import math

import jax
import jax.numpy as jnp
from jax.experimental import pallas as pl
from jax.experimental.pallas import tpu as pltpu


def _round_up(a: int, b: int) -> int:
    return (a + b - 1) // b * b


def _cdiv(a: int, b: int) -> int:
    return (a + b - 1) // b


def _chip_defaults():
    """Per-generation tile / VMEM defaults (see review feedback)."""
    try:
        kind = jax.devices()[0].device_kind.lower()
    except Exception:
        kind = ""
    if "v7" in kind:
        # v7x: 64 MiB VMEM, 3.2 TB/s HBM (~310 flop/B crossover): 512-class
        # tiles already saturate the MXU; keep footprint well under 48 MiB.
        return dict(tm=512, tn=512, tk=1024, vmem=48 << 20, cores=2)
    if "v6" in kind or "trillium" in kind:
        # v6e: ~650 flop/B crossover -> big tiles; 128 MiB physical VMEM.
        return dict(tm=512, tn=1024, tk=1024, vmem=64 << 20, cores=1)
    if "v5 lite" in kind or "v5e" in kind or "v5litepod" in kind:
        # v5e: ~240 flop/B crossover; default scoped VMEM is only 16 MiB.
        return dict(tm=512, tn=512, tk=1024, vmem=64 << 20, cores=1)
    if "v5" in kind:  # v5p
        return dict(tm=512, tn=512, tk=1024, vmem=64 << 20, cores=1)
    # Unknown chip: conservative tiles, leave the scoped VMEM limit alone.
    return dict(tm=256, tn=512, tk=512, vmem=None, cores=1)


def _make_kernel(has_bias: bool, n_k_steps: int, use_scratch: bool, compute_dtype):
    """Kernel body: one (tm, tn) output tile, reduced over the K grid axis."""

    def kernel(*refs):
        x_ref, wt_ref = refs[0], refs[1]
        idx = 2
        b_ref = None
        if has_bias:
            b_ref = refs[idx]
            idx += 1
        o_ref = refs[idx]
        idx += 1
        # f32 outputs accumulate straight into the resident output block
        # (no scratch); otherwise a f32 VMEM scratch accumulator is used.
        acc_ref = refs[idx] if use_scratch else o_ref

        # bf16 cast on the VPU inside the tile (no extra wrapper HBM pass).
        x_tile = x_ref[...]
        if x_tile.dtype != compute_dtype:
            x_tile = x_tile.astype(compute_dtype)

        # (tm, tk) @ (tk, tn) on the MXU, f32 accumulation.
        partial = jnp.dot(x_tile, wt_ref[...], preferred_element_type=jnp.float32)

        def finalize(acc_f32):
            # "all-reduce done": add bias after the reduction, cast out.
            if b_ref is not None:
                acc_f32 = acc_f32 + b_ref[...].astype(jnp.float32)
            o_ref[...] = acc_f32.astype(o_ref.dtype)

        if n_k_steps == 1:
            finalize(partial)
        else:
            k = pl.program_id(2)
            last = n_k_steps - 1

            # First reduction step: write directly (no zero-fill RMW).
            @pl.when(k == 0)
            def _():
                acc_ref[...] = partial.astype(acc_ref.dtype)

            # Middle steps: accumulate.
            @pl.when((k > 0) & (k < last))
            def _():
                acc_ref[...] += partial.astype(acc_ref.dtype)

            # Last step: fold the final partial + bias straight into the
            # output (saves one tm*tn f32 store+load round-trip per tile).
            @pl.when(k == last)
            def _():
                finalize(acc_ref[...].astype(jnp.float32) + partial)

    return kernel


def make_row_sharded_linear(
    weight,
    bias,
    gang_size: int,
    *,
    compute_dtype=jnp.bfloat16,
    tm=None,
    tn=None,
    tk=None,
    vmem_limit_bytes=None,
):
    """One-time preparation of the RowShardedLinear parameters.

    weight: (output_dim, input_dim)  full (gathered) weight; sharded along
            dim=1 by the gang in the PyTorch module.
    bias:   (output_dim,) or None.

    Returns `forward(x)` with x: (..., input_dim) -> (..., output_dim).
    The weight transpose / cast / padding happens exactly once here, NOT per
    forward call.
    """
    output_dim, input_dim = weight.shape
    if input_dim % gang_size != 0:
        raise ValueError(
            f"input_dim ({input_dim}) must be a multiple of gang size ({gang_size})."
        )

    d = _chip_defaults()
    tm = d["tm"] if tm is None else tm
    tn = d["tn"] if tn is None else tn
    tk = d["tk"] if tk is None else tk
    if vmem_limit_bytes is None:
        vmem_limit_bytes = d["vmem"]
    num_cores = d["cores"]

    # Clamp N/K tiles to the (aligned) problem size; keep them multiples of
    # 256 (v6e/v7x MXU is 2x256x256) unless the dim itself is tiny.
    tn = min(tn, _round_up(output_dim, 128 if output_dim <= 128 else 256))
    tk = min(tk, _round_up(input_dim, 128 if input_dim <= 128 else 256))

    n_pad = _round_up(output_dim, tn)
    k_pad = _round_up(input_dim, tk)
    n_k_steps = k_pad // tk

    # One-time weight transform: K-major (K, N) bf16, padded to the tile grid.
    w_kn = jnp.asarray(weight).T.astype(compute_dtype)
    if k_pad != input_dim or n_pad != output_dim:
        w_kn = jnp.pad(w_kn, ((0, k_pad - input_dim), (0, n_pad - output_dim)))

    has_bias = bias is not None
    if has_bias:
        b2d = jnp.asarray(bias, dtype=jnp.float32).reshape(1, output_dim)
        if n_pad != output_dim:
            b2d = jnp.pad(b2d, ((0, 0), (0, n_pad - output_dim)))
    else:
        b2d = None

    w_bytes = jnp.dtype(compute_dtype).itemsize

    def forward(x):
        *lead, in_dim = x.shape
        assert in_dim == input_dim
        m = 1
        for s in lead:
            m *= s
        out_dtype = x.dtype

        # M tile: multiple of 16 (bf16 packs 16 rows per vreg sublane group).
        tm_c = min(tm, _round_up(m, 16))
        tn_c = tn

        # v7x: make sure there are >= num_cores parallel (M, N) output tiles
        # so both TensorCores get work on small-batch shapes.
        if num_cores > 1:
            while (_cdiv(m, tm_c) * _cdiv(n_pad, tn_c)) < num_cores:
                if tn_c % 2 == 0 and (tn_c // 2) % 128 == 0 and n_pad % (tn_c // 2) == 0:
                    tn_c //= 2
                elif tm_c >= 32:
                    tm_c //= 2
                else:
                    break
            # TODO(synk): a grid of (1, 1, K) would need a split-K scheme
            # (per-core accumulator + combine) to use both v7x cores.

        m_pad = _round_up(m, tm_c)

        # x is only padded when actually required; the bf16 cast happens on
        # the VPU inside the kernel, so there is no extra HBM pass over x.
        x2d = x.reshape(m, input_dim)
        if m_pad != m or k_pad != input_dim:
            x2d = jnp.pad(x2d, ((0, m_pad - m), (0, k_pad - input_dim)))

        use_scratch = (n_k_steps > 1) and (out_dtype != jnp.float32)

        # Weight spec: deepen the pipeline when the K reduction is long
        # (weight-stream-bound, small-M regime).
        if n_k_steps >= 3:
            w_spec = pl.BlockSpec(
                (tk, tn_c), lambda i, j, kk: (kk, j), pipeline_mode=pl.Buffered(3)
            )
        else:
            w_spec = pl.BlockSpec((tk, tn_c), lambda i, j, kk: (kk, j))

        operands = [x2d, w_kn]
        in_specs = [pl.BlockSpec((tm_c, tk), lambda i, j, kk: (i, kk)), w_spec]
        if has_bias:
            operands.append(b2d)
            in_specs.append(pl.BlockSpec((1, tn_c), lambda i, j, kk: (0, j)))

        grid = (m_pad // tm_c, n_pad // tn_c, n_k_steps)

        x_bytes = x2d.dtype.itemsize
        o_bytes = jnp.dtype(out_dtype).itemsize
        cost = pl.CostEstimate(
            flops=2 * m_pad * n_pad * k_pad,
            transcendentals=0,
            # Account for re-reads across the output grid: x is streamed once
            # per N-tile column, W once per M-tile row.
            bytes_accessed=(m_pad * k_pad * x_bytes) * grid[1]
            + (k_pad * n_pad * w_bytes) * grid[0]
            + m_pad * n_pad * o_bytes
            + (n_pad * 4 * grid[0] if has_bias else 0),
        )

        cp_kwargs = dict(dimension_semantics=("parallel", "parallel", "arbitrary"))
        if vmem_limit_bytes is not None:
            cp_kwargs["vmem_limit_bytes"] = vmem_limit_bytes

        out = pl.pallas_call(
            _make_kernel(has_bias, n_k_steps, use_scratch, compute_dtype),
            out_shape=jax.ShapeDtypeStruct((m_pad, n_pad), out_dtype),
            grid_spec=pltpu.PrefetchScalarGridSpec(
                num_scalar_prefetch=0,
                # Reduction (gang-rank x K-tile, folded together) is LAST.
                grid=grid,
                in_specs=in_specs,
                out_specs=pl.BlockSpec((tm_c, tn_c), lambda i, j, kk: (i, j)),
                scratch_shapes=(
                    [pltpu.VMEM((tm_c, tn_c), jnp.float32)] if use_scratch else []
                ),
            ),
            compiler_params=pltpu.CompilerParams(**cp_kwargs),
            cost_estimate=cost,
        )(*operands)

        out = out[:m, :output_dim]
        return out.reshape(*lead, output_dim)

    return forward


def row_sharded_linear(x, weight, bias, gang_size, **kwargs):
    """One-shot convenience wrapper (prepares the weight on the fly).

    For repeated calls, use `make_row_sharded_linear` so the weight
    transpose/cast/pad is done once, not per forward.
    """
    return make_row_sharded_linear(weight, bias, gang_size, **kwargs)(x)


if __name__ == "__main__":
    key = jax.random.PRNGKey(0)
    k1, k2, k3, k4, k5, k6 = jax.random.split(key, 6)

    # --- Case 1: f32 activations, bias, single K step -----------------------
    # batch=2, seq=8, input_dim=256, output_dim=64, gang.size=2 -> Ks=128.
    batch, seq = 2, 8
    input_dim, output_dim, gang_size = 256, 64, 2

    # Deterministic init matching _init_uniform on the full Linear:
    # kaiming_uniform_(a=sqrt(5)) -> U(-1/sqrt(fan_in), 1/sqrt(fan_in)).
    bound = 1.0 / math.sqrt(input_dim)
    weight = jax.random.uniform(
        k1, (output_dim, input_dim), jnp.float32, minval=-bound, maxval=bound
    )
    bias = jax.random.uniform(
        k2, (output_dim,), jnp.float32, minval=-bound, maxval=bound
    )
    x = jax.random.normal(k3, (batch, seq, input_dim), jnp.float32)

    fwd = make_row_sharded_linear(weight, bias, gang_size)  # weight prepared ONCE
    y = jax.block_until_ready(fwd(x))
    assert y.shape == (batch, seq, output_dim)

    # Reference with the same bf16 inputs / f32 accumulation (tight tolerance).
    xb = x.reshape(-1, input_dim).astype(jnp.bfloat16)
    wb = weight.T.astype(jnp.bfloat16)
    ref = (
        jnp.dot(xb, wb, preferred_element_type=jnp.float32).reshape(
            batch, seq, output_dim
        )
        + bias
    )
    assert jnp.allclose(y, ref, atol=1e-3, rtol=1e-3)

    # Full-f32 reference of the unsharded linear (loose tolerance, bf16 MXU path).
    ref_f32 = x @ weight.T + bias
    assert jnp.allclose(y, ref_f32, atol=3e-2, rtol=3e-2)

    # --- Case 2: bias=None path (no bias operand is materialized) -----------
    y_nb = jax.block_until_ready(row_sharded_linear(x, weight, None, gang_size))
    ref_nb = jnp.dot(xb, wb, preferred_element_type=jnp.float32).reshape(
        batch, seq, output_dim
    )
    assert jnp.allclose(y_nb, ref_nb, atol=1e-3, rtol=1e-3)

    # --- Case 3: bf16 activations/output, multi-step K reduction (scratch) ---
    in2, out2 = 512, 128
    b2 = 1.0 / math.sqrt(in2)
    w2 = jax.random.uniform(k4, (out2, in2), jnp.float32, minval=-b2, maxval=b2)
    bias2 = jax.random.uniform(k5, (out2,), jnp.float32, minval=-b2, maxval=b2)
    x2 = jax.random.normal(k6, (batch, seq, in2), jnp.float32).astype(jnp.bfloat16)

    fwd2 = make_row_sharded_linear(w2, bias2, gang_size, tk=256)  # 2 K-steps
    y2 = jax.block_until_ready(fwd2(x2))
    assert y2.shape == (batch, seq, out2)
    ref2 = (
        jnp.dot(
            x2.reshape(-1, in2),
            w2.T.astype(jnp.bfloat16),
            preferred_element_type=jnp.float32,
        ).reshape(batch, seq, out2)
        + bias2
    )
    assert jnp.allclose(y2.astype(jnp.float32), ref2, atol=3e-2, rtol=3e-2)

    print("KERNEL_OK")
</pallas_src>

<mosaic_0001>
module attributes {stable_mosaic.version = 11 : i64} {
  func.func @kernel(%arg0: i32, %arg1: i32, %arg2: i32, %arg3: memref<16x256xf32, #tpu.memory_space<vmem>>, %arg4: memref<256x128xbf16, #tpu.memory_space<vmem>>, %arg5: memref<1x128xf32, #tpu.memory_space<vmem>>, %arg6: memref<16x128xf32, #tpu.memory_space<vmem>>) attributes {dimension_semantics = [#tpu.dimension_semantics<parallel>, #tpu.dimension_semantics<parallel>, #tpu.dimension_semantics<arbitrary>], iteration_bounds = array<i64: 1, 1, 1>, scalar_prefetch = 0 : i64, scratch_operands = 0 : i64, tpu.core_type = #tpu.core_type<tc>, window_params = [{transform_indices = @transform_0, window_bounds = array<i64: 16, 256>}, {transform_indices = @transform_1, window_bounds = array<i64: 256, 128>}, {transform_indices = @transform_2, window_bounds = array<i64: 1, 128>}, {transform_indices = @transform_3, window_bounds = array<i64: 16, 128>}]} {
    %c0 = arith.constant 0 : index
    %c0_0 = arith.constant 0 : index
    %0 = vector.load %arg3[%c0, %c0_0] : memref<16x256xf32, #tpu.memory_space<vmem>>, vector<16x256xf32>
    %1 = arith.truncf %0 : vector<16x256xf32> to vector<16x256xbf16>
    %c0_1 = arith.constant 0 : index
    %c0_2 = arith.constant 0 : index
    %2 = vector.load %arg4[%c0_1, %c0_2] : memref<256x128xbf16, #tpu.memory_space<vmem>>, vector<256x128xbf16>
    %cst = arith.constant dense<0.000000e+00> : vector<16x128xf32>
    %3 = tpu.matmul %1, %2, %cst {dimension_numbers = #tpu.dot_dimension_numbers<[1], [0], [0], [1], [0, 0, 1, 1], [], []>} : vector<16x256xbf16>, vector<256x128xbf16>, vector<16x128xf32> -> vector<16x128xf32>
    %c0_3 = arith.constant 0 : index
    %c0_4 = arith.constant 0 : index
    %4 = vector.load %arg5[%c0_3, %c0_4] : memref<1x128xf32, #tpu.memory_space<vmem>>, vector<1x128xf32>
    %5 = vector.broadcast %4 : vector<1x128xf32> to vector<16x128xf32>
    %6 = arith.addf %3, %5 : vector<16x128xf32>
    %c0_5 = arith.constant 0 : index
    %c0_6 = arith.constant 0 : index
    %7 = vector.load %arg6[%c0_5, %c0_6] : memref<16x128xf32, #tpu.memory_space<vmem>>, vector<16x128xf32>
    tpu.vector_store %arg6[%c0_5, %c0_6], %6 {strides = array<i32>} : memref<16x128xf32, #tpu.memory_space<vmem>>, vector<16x128xf32>,
    return
  }
  func.func @transform_0(%arg0: i32, %arg1: i32, %arg2: i32) -> (i32, i32) {
    %c0_i32 = arith.constant 0 : i32
    return %arg0, %arg2 : i32, i32
  }
  func.func @transform_1(%arg0: i32, %arg1: i32, %arg2: i32) -> (i32, i32) {
    %c0_i32 = arith.constant 0 : i32
    return %arg2, %arg1 : i32, i32
  }
  func.func @transform_2(%arg0: i32, %arg1: i32, %arg2: i32) -> (i32, i32) {
    %c0_i32 = arith.constant 0 : i32
    %c0_i32_0 = arith.constant 0 : i32
    return %c0_i32, %arg1 : i32, i32
  }
  func.func @transform_3(%arg0: i32, %arg1: i32, %arg2: i32) -> (i32, i32) {
    %c0_i32 = arith.constant 0 : i32
    return %arg0, %arg1 : i32, i32
  }
}

</mosaic_0001>

<bundles_post_ra>
// kernel: tpu_custom_call.1
= control target key start
LH: loop header
LB: loop body
LE: loop exit
PB: predicated region body
PF: predicated region fallthrough
CT: control target
= control target key end

     0   :  { %8 = vsyncpa [#allocation3], 0  ;;  %s444_s0 = inlined_call_operand.hbm [shape: f32[16,256], index: 0, kind: input, shape index: {}]   ;;  %s445_s1 = inlined_call_operand.hbm [shape: bf16[256,128], index: 1, kind: input, shape index: {}]   ;;  %s446_s2 = inlined_call_operand.vmem [shape: f32[1,128], index: 2, kind: input, shape index: {}]   ;;  %s447_s3 = inlined_call_operand.hbm [shape: f32[16,128], index: 3, kind: output, shape index: {}]  }
   0x1   :  { %9 = vsyncpa [#allocation6], 0 }
   0x2   :  { %10 = vsyncpa [#allocation4], 0  ;;  %s15_s14 = sshll.u32 %s444_s0, 4  ;;  %s403_s15 = smov [#allocation2]   ;;  %s16_s14 = int_to_ptr.hbm [resolvable:$true] %s15_s14 }
   0x3   :  { %s17_s16 = sshll.u32 %s403_s15, 4  ;;  %s28_s19 = sshll.u32 %s445_s1, 4  ;;  %s18_s16 = int_to_ptr.vmem [resolvable:$true] %s17_s16  ;;  %s29_s19 = int_to_ptr.hbm [resolvable:$true] %s28_s19 }
   0x4   :  { %s404_s20 = smov 256   ;;  %s405_s21 = smov 16  }
   0x5   :  { %23 = dma.hbm_to_vmem [thread:$0]  %s16_s14, 512, %s18_s16, [#allocation3], %s404_s20, %s404_s20, %s405_s21  }
   0x6   :  { %s406_s22 = smov [#allocation5]   ;;  %s407_s24 = smov 64  }
   0x7   :  { %s30_s23 = sshll.u32 %s406_s22, 4  ;;  %s408_s25 = smov 4   ;;  %s31_s23 = int_to_ptr.vmem [resolvable:$true] %s30_s23 }
   0x8   :  { %36 = dma.hbm_to_vmem [thread:$0]  %s29_s19, 2048, %s31_s23, [#allocation6], %s407_s24, %s407_s24, %s408_s25  }
   0x9   :  { %397 = dma.done.wait [#allocation3], 512  }
   0xa   :  { %398 = vsyncadd [#allocation3], 4294966784 }
   0xb   :  { %399 = dma.done.wait [#allocation6], 2048  }
   0xc   :  { %400 = vsyncadd [#allocation6], 4294965248  ;;  %v306_v0 = vld [vmem:[#allocation5 + $0x38] sm:$0xff]  ;;  %v305_v2 = vld [vmem:[#allocation5 + $0x30] sm:$0xff]  ;;  %s409_s26 = smov [#allocation7]   ;;  %s221_s30 = sshll.u32 %s447_s3, 4  ;;  %s222_s30 = int_to_ptr.hbm [resolvable:$true] %s221_s30 }
   0xd   :  { %v314_v1 = vld [vmem:[#allocation5 + $0x78] sm:$0xff]  ;;  %185 = vmatpush.bf16.msra.mxu0 %v306_v0  ;;  %v313_v3 = vld [vmem:[#allocation5 + $0x70] sm:$0xff]  ;;  %v304_v4 = vld [vmem:[#allocation5 + $0x28] sm:$0xff]  ;;  %s219_s27 = sshll.u32 %s409_s26, 4  ;;  %s410_s4 = smov 128   ;;  %s220_s27 = int_to_ptr.vmem [resolvable:$true] %s219_s27 }
   0xe   :  { %199 = vmatpush.bf16.msra.mxu1 %v314_v1  ;;  %v312_v5 = vld [vmem:[#allocation5 + $0x68] sm:$0xff]  ;;  %v303_v6 = vld [vmem:[#allocation5 + $0x20] sm:$0xff]  ;;  %v302_v8 = vld [vmem:[#allocation5 + $0x18] sm:$0xff] }
   0xf   :  { %v311_v7 = vld [vmem:[#allocation5 + $0x60] sm:$0xff]  ;;  %v310_v9 = vld [vmem:[#allocation5 + $0x58] sm:$0xff]  ;;  %v301_v10 = vld [vmem:[#allocation5 + $0x10] sm:$0xff] }
  0x10   :  { %v309_v11 = vld [vmem:[#allocation5 + $0x50] sm:$0xff]  ;;  %v300_v12 = vld [vmem:[#allocation5 + $0x8] sm:$0xff]  ;;  %v299_v14 = vld [vmem:[#allocation5] sm:$0xff] }
  0x11   :  { %186 = vmatpush.bf16.msra.mxu0 %v305_v2  ;;  %v308_v13 = vld [vmem:[#allocation5 + $0x48] sm:$0xff]  ;;  %v307_v15 = vld [vmem:[#allocation5 + $0x40] sm:$0xff]  ;;  %v49_v17 = vld [vmem:[#allocation2 + $0x10] sm:$0xff] }
  0x12   :  { %200 = vmatpush.bf16.msra.mxu1 %v313_v3  ;;  %v47_v16 = vld [vmem:[#allocation2] sm:$0xff]  ;;  %v48_v18 = vld [vmem:[#allocation2 + $0x8] sm:$0xff]  ;;  %v50_v19 = vld [vmem:[#allocation2 + $0x18] sm:$0xff] }
  0x13   :  { %v51_v20 = vpack.c.bf16 %v49_v17, %v47_v16  ;;  %v52_v21 = vpack.c.bf16 %v50_v19, %v48_v18  ;;  %v324_v22 = vld [vmem:[%s446_s2] ss:$0 sm:$0xff]  ;;  %s411_s2 = smov 8  }
  0x15   :  { %187 = vmatpush.bf16.msra.mxu0 %v304_v4 }
  0x16   :  { %201 = vmatpush.bf16.msra.mxu1 %v312_v5 }
  0x19   :  { %188 = vmatpush.bf16.msra.mxu0 %v303_v6 }
  0x1a   :  { %202 = vmatpush.bf16.msra.mxu1 %v311_v7 }
  0x1d   :  { %189 = vmatpush.bf16.msra.mxu0 %v302_v8 }
  0x1e   :  { %203 = vmatpush.bf16.msra.mxu1 %v310_v9 }
  0x21   :  { %190 = vmatpush.bf16.msra.mxu0 %v301_v10 }
  0x22   :  { %204 = vmatpush.bf16.msra.mxu1 %v309_v11 }
  0x25   :  { %191 = vmatpush.bf16.msra.mxu0 %v300_v12 }
  0x26   :  { %205 = vmatpush.bf16.msra.mxu1 %v308_v13 }
  0x29   :  { %192 = vmatpush.bf16.msra.mxu0 %v299_v14 }
  0x2a   :  { %206 = vmatpush.bf16.msra.mxu1 %v307_v15 }
  0x2c   :  { %193 = vmatmul.bf16.vlgmr.msra.gmra.mxu0 %v51_v20 }
  0x2d   :  { %207 = vmatmul.bf16.vlgmr.msra.gmra.mxu1 %v52_v21 }
  0xa9   :  { %v194_v23 = vpop.f32.mrf.mxu0 }
  0xaa   :  { %v208_v24 = vpop.f32.mrf.mxu1  ;;  %v195_v25 = vadd.f32 %v324_v22, %v194_v23 }
  0xac   :  { %v209_v26 = vadd.f32 %v208_v24, %v195_v25 }
  0xae   :  { %213 = vst [vmem:[#allocation7] sm:$0xff] %v209_v26 }
  0xb1   :  { %v196_v27 = vpop.f32.mrf.mxu0 }
  0xb2   :  { %v197_v28 = vadd.f32 %v324_v22, %v196_v27  ;;  %v210_v29 = vpop.f32.mrf.mxu1 }
  0xb4   :  { %v211_v30 = vadd.f32 %v210_v29, %v197_v28 }
  0xb6   :  { %214 = vst [vmem:[#allocation7 + $0x8] sm:$0xff] %v211_v30 }
  0xb7   :  { %227 = dma.vmem_to_hbm [thread:$0]  %s220_s27, 256, %s222_s30, [#allocation4], %s410_s4, %s410_s4, %s411_s2  }
  0xb8   :  { %401 = dma.done.wait [#allocation4], 256  }
  0xb9   :  { %402 = vsyncadd [#allocation4], 4294967040 }
  0xba   :  { %232 = vsyncpa [#allocation3], 1 }
  0xbb   :  { %233 = vsyncpa [#allocation6], 1 }
  0xbc   :  { %234 = vsyncpa [#allocation4], 1 }

</bundles_post_ra>
